<compile_context>
chip_gen: v5e
topology: v5e:2x2
jax: 0.10.0
libtpu: 0.0.40
codegen_flags: <defaults>
</compile_context>

<pallas_src>
import functools

import jax
import jax.numpy as jnp
from jax import lax
from jax.experimental import pallas as pl
from jax.experimental.pallas import tpu as pltpu


def _disc_kernel(x_ref, w1_ref, b1_ref, w2_ref, b2_ref, o_ref):
    # x tile: [TB, E] in its stored dtype (f32 or bf16); w1 is pre-cast to the
    # same dtype by the wrapper so the MXU runs the native path with f32 acc.
    x = x_ref[...]
    h = jnp.dot(x, w1_ref[...], preferred_element_type=jnp.float32)   # [TB, 10]
    h = jnp.maximum(h + b1_ref[...], 0.0)                             # ReLU, f32

    # Layer 2 (10 -> 1): contract the hidden dim while keeping the batch tile
    # on the lane axis: logits[0, b] = sum_h w2[0, h] * h[b, h]  -> [1, TB].
    # Lane-dense straight off the MXU — no relayout, no masked stores.
    w2 = w2_ref[...].astype(jnp.float32)                              # [1, 10]
    logits = lax.dot_general(
        w2, h,
        dimension_numbers=(((1,), (1,)), ((), ())),
        preferred_element_type=jnp.float32,
    ) + b2_ref[...]                                                   # [1, TB]

    # sigmoid(z) = 1 / (1 + exp(-z)); exp + approx reciprocal both on the EUP.
    probs = pl.reciprocal(jnp.exp(-logits) + 1.0, approx=True)
    o_ref[...] = probs.astype(o_ref.dtype)


def _round_down_128(n):
    return max(128, (n // 128) * 128)


def _round_up_128(n):
    return ((n + 127) // 128) * 128


@functools.lru_cache(maxsize=None)
def _vmem_capacity_bytes():
    """Physical VMEM per TensorCore; falls back to the v7x floor (64 MiB)."""
    try:
        return int(pltpu.get_tpu_info().vmem_capacity_bytes)
    except Exception:  # non-TPU trace / older runtime
        return 64 * 1024 * 1024


def _tile_plan(B, E, x_itemsize, out_itemsize, requested):
    """Pick (block_b, vmem_limit_bytes) by byte budget, generation-aware."""
    vmem_cap = _vmem_capacity_bytes()
    # Total budget for: 2x x slab (double-buffered) + f32 hidden (lane-padded
    # to 128) + 2x output slab (sublane-padded to 8).
    big_vmem = vmem_cap >= 96 * 1024 * 1024          # v5e/v6e (128 MiB)
    budget = (64 if big_vmem else 28) * 1024 * 1024  # v7x: 64 MiB physical
    per_row = 2 * E * x_itemsize + 128 * 4 + 2 * 8 * out_itemsize
    cap = min(32768, _round_down_128(budget // per_row))

    if requested is not None:
        blk = min(cap, _round_down_128(requested))   # enforce budget on caller
        block_b = B if blk >= B else blk
    elif B < 256:
        block_b = B                                  # single full-extent tile
    elif B <= cap:
        # Force >= 2 grid tiles: lets dimension_semantics=("parallel",) shard
        # the batch axis across v7x's 2 TCs and keeps double-buffering alive.
        block_b = min(cap, _round_up_128(pl.cdiv(B, 2)))
    else:
        block_b = cap

    needed = (2 * block_b * E * x_itemsize           # double-buffered x
              + block_b * 128 * 4                    # f32 hidden, lane-padded
              + 2 * 8 * block_b * out_itemsize       # double-buffered output
              + (2 << 20))                           # weights + slack
    vmem_limit = int(min(max(needed + (8 << 20), 32 << 20),
                         vmem_cap - (4 << 20)))
    vmem_limit = max(vmem_limit, 16 << 20)
    return block_b, vmem_limit
    # TODO(synk): if profiling still shows exposed DMA on v7x, sweep
    # pipeline_mode=pl.Buffered(3) on the x BlockSpec (costs one extra x slab).


@functools.partial(jax.jit, static_argnames=("block_b",))
def discriminator_forward(x, w1, b1, w2, b2, *, block_b=None):
    """x: [B, emb_dim] -> [B, 1]; same math as the PyTorch Discriminator."""
    B, E = x.shape
    H = w1.shape[1]      # 10
    out_dtype = x.dtype

    blk, vmem_limit = _tile_plan(B, E, x.dtype.itemsize,
                                 jnp.dtype(out_dtype).itemsize, block_b)
    num_tiles = pl.cdiv(B, blk)
    b_pad = num_tiles * blk

    w1_c = w1.astype(x.dtype)                 # keep MXU on the native dtype path
    b1_row = b1.reshape(1, H).astype(jnp.float32)
    w2_row = w2.reshape(1, H)                 # [10, 1] -> [1, 10], same order
    b2_sc = b2.reshape(1, 1).astype(jnp.float32)

    flops = 2 * B * E * H + 2 * B * H
    bytes_accessed = (
        B * E * x.dtype.itemsize
        + B * jnp.dtype(out_dtype).itemsize
        + w1_c.size * w1_c.dtype.itemsize
        + w2.size * w2.dtype.itemsize
        + b1.size * b1.dtype.itemsize
        + b2.size * b2.dtype.itemsize
    )

    out_row = pl.pallas_call(
        _disc_kernel,
        out_shape=jax.ShapeDtypeStruct((1, b_pad), out_dtype),
        grid_spec=pltpu.PrefetchScalarGridSpec(
            num_scalar_prefetch=0,
            grid=(num_tiles,),
            in_specs=[
                pl.BlockSpec((blk, E), lambda i: (i, 0)),   # x batch tile
                pl.BlockSpec((E, H), lambda i: (0, 0)),     # w1 (whole, resident)
                pl.BlockSpec((1, H), lambda i: (0, 0)),     # b1
                pl.BlockSpec((1, H), lambda i: (0, 0)),     # w2 row
                pl.BlockSpec((1, 1), lambda i: (0, 0)),     # b2
            ],
            out_specs=pl.BlockSpec((1, blk), lambda i: (0, i)),   # lane-dense
        ),
        compiler_params=pltpu.CompilerParams(
            dimension_semantics=("parallel",),
            vmem_limit_bytes=vmem_limit,
        ),
        cost_estimate=pl.CostEstimate(
            flops=flops, transcendentals=B, bytes_accessed=bytes_accessed),
    )(x, w1_c, b1_row, w2_row, b2_sc)

    # Free layout plumbing back to the PyTorch-style (B, 1) output; this slice
    # also drops the ragged-tile padding — keep it.
    return out_row[0, :B].reshape(B, 1)


def init_params(key, emb_dim):
    """Deterministic init mirroring nn.Linear shapes: (emb_dim->10), (10->1)."""
    k1, k2, k3, k4 = jax.random.split(key, 4)
    lim1 = 1.0 / jnp.sqrt(emb_dim)
    lim2 = 1.0 / jnp.sqrt(10.0)
    w1 = jax.random.uniform(k1, (emb_dim, 10), jnp.float32, -lim1, lim1)
    b1 = jax.random.uniform(k2, (10,), jnp.float32, -lim1, lim1)
    w2 = jax.random.uniform(k3, (10, 1), jnp.float32, -lim2, lim2)
    b2 = jax.random.uniform(k4, (1,), jnp.float32, -lim2, lim2)
    return w1, b1, w2, b2


if __name__ == "__main__":
    key = jax.random.PRNGKey(0)
    kx, kp, kx2 = jax.random.split(key, 3)

    def reference(x, w1, b1, w2, b2):
        h = jnp.maximum(x @ w1 + b1, 0.0)
        return jax.nn.sigmoid(h @ w2 + b2)

    # approx=True sigmoid reciprocal -> relax tolerance slightly.
    TOL = dict(atol=2e-3, rtol=2e-3)

    # Small shapes consistent with the module.
    B, emb_dim = 64, 32
    x = jax.random.normal(kx, (B, emb_dim), dtype=jnp.float32)
    w1, b1, w2, b2 = init_params(kp, emb_dim)

    out = jax.block_until_ready(discriminator_forward(x, w1, b1, w2, b2))
    ref = reference(x, w1, b1, w2, b2)
    assert out.shape == (B, 1)
    assert jnp.allclose(out, ref, **TOL), "mismatch vs reference (single tile)"

    # Auto multi-tile path (forced >=2 tiles, ragged last tile).
    B2 = 300
    x2 = jax.random.normal(kx2, (B2, emb_dim), dtype=jnp.float32)
    out2 = jax.block_until_ready(discriminator_forward(x2, w1, b1, w2, b2))
    ref2 = reference(x2, w1, b1, w2, b2)
    assert out2.shape == (B2, 1)
    assert jnp.allclose(out2, ref2, **TOL), "mismatch (auto-tiled path)"

    # Explicit (clamped) block size path.
    out3 = jax.block_until_ready(
        discriminator_forward(x2, w1, b1, w2, b2, block_b=128))
    assert out3.shape == (B2, 1)
    assert jnp.allclose(out3, ref2, **TOL), "mismatch (explicit block path)"

    print("KERNEL_OK")
</pallas_src>

<mosaic_0001>
module attributes {stable_mosaic.version = 11 : i64} {
  func.func @_disc_kernel(%arg0: i32, %arg1: memref<64x32xf32, #tpu.memory_space<vmem>>, %arg2: memref<32x10xf32, #tpu.memory_space<vmem>>, %arg3: memref<1x10xf32, #tpu.memory_space<vmem>>, %arg4: memref<1x10xf32, #tpu.memory_space<vmem>>, %arg5: memref<1x1xf32, #tpu.memory_space<vmem>>, %arg6: memref<1x64xf32, #tpu.memory_space<vmem>>) attributes {dimension_semantics = [#tpu.dimension_semantics<parallel>], iteration_bounds = array<i64: 1>, scalar_prefetch = 0 : i64, scratch_operands = 0 : i64, tpu.core_type = #tpu.core_type<tc>, window_params = [{transform_indices = @transform_0, window_bounds = array<i64: 64, 32>}, {pipeline_mode = #tpu.pipeline_mode<synchronous>, transform_indices = @transform_1, window_bounds = array<i64: 32, 10>}, {pipeline_mode = #tpu.pipeline_mode<synchronous>, transform_indices = @transform_2, window_bounds = array<i64: 1, 10>}, {pipeline_mode = #tpu.pipeline_mode<synchronous>, transform_indices = @transform_3, window_bounds = array<i64: 1, 10>}, {pipeline_mode = #tpu.pipeline_mode<synchronous>, transform_indices = @transform_4, window_bounds = array<i64: 1, 1>}, {transform_indices = @transform_5, window_bounds = array<i64: 1, 64>}]} {
    %c0 = arith.constant 0 : index
    %c0_0 = arith.constant 0 : index
    %0 = vector.load %arg1[%c0, %c0_0] : memref<64x32xf32, #tpu.memory_space<vmem>>, vector<64x32xf32>
    %c0_1 = arith.constant 0 : index
    %c0_2 = arith.constant 0 : index
    %1 = vector.load %arg2[%c0_1, %c0_2] : memref<32x10xf32, #tpu.memory_space<vmem>>, vector<32x10xf32>
    %cst = arith.constant dense<0.000000e+00> : vector<64x10xf32>
    %2 = tpu.matmul %0, %1, %cst {dimension_numbers = #tpu.dot_dimension_numbers<[1], [0], [0], [1], [0, 0, 1, 1], [], []>} : vector<64x32xf32>, vector<32x10xf32>, vector<64x10xf32> -> vector<64x10xf32>
    %c0_3 = arith.constant 0 : index
    %c0_4 = arith.constant 0 : index
    %3 = vector.load %arg3[%c0_3, %c0_4] : memref<1x10xf32, #tpu.memory_space<vmem>>, vector<1x10xf32>
    %4 = vector.broadcast %3 : vector<1x10xf32> to vector<64x10xf32>
    %5 = arith.addf %2, %4 : vector<64x10xf32>
    %cst_5 = arith.constant 0.000000e+00 : f32
    %6 = vector.broadcast %cst_5 : f32 to vector<64x10xf32>
    %7 = arith.maximumf %5, %6 : vector<64x10xf32>
    %c0_6 = arith.constant 0 : index
    %c0_7 = arith.constant 0 : index
    %8 = vector.load %arg4[%c0_6, %c0_7] : memref<1x10xf32, #tpu.memory_space<vmem>>, vector<1x10xf32>
    %cst_8 = arith.constant dense<0.000000e+00> : vector<1x64xf32>
    %9 = tpu.matmul %8, %7, %cst_8 {dimension_numbers = #tpu.dot_dimension_numbers<[1], [1], [0], [0], [0, 0, 1, 0], [], []>} : vector<1x10xf32>, vector<64x10xf32>, vector<1x64xf32> -> vector<1x64xf32>
    %c0_9 = arith.constant 0 : index
    %c0_10 = arith.constant 0 : index
    %10 = vector.load %arg5[%c0_9, %c0_10] : memref<1x1xf32, #tpu.memory_space<vmem>>, vector<1x1xf32>
    %11 = vector.broadcast %10 : vector<1x1xf32> to vector<1x64xf32>
    %12 = arith.addf %9, %11 : vector<1x64xf32>
    %cst_11 = arith.constant 0.000000e+00 : f32
    %13 = vector.broadcast %cst_11 : f32 to vector<1x64xf32>
    %14 = arith.subf %13, %12 : vector<1x64xf32>
    %15 = math.exp %14 : vector<1x64xf32>
    %cst_12 = arith.constant 1.000000e+00 : f32
    %16 = vector.broadcast %cst_12 : f32 to vector<1x64xf32>
    %17 = arith.addf %15, %16 : vector<1x64xf32>
    %18 = tpu.reciprocal %17 {approx = true} : vector<1x64xf32> -> vector<1x64xf32>
    %c0_13 = arith.constant 0 : index
    %c0_14 = arith.constant 0 : index
    %19 = vector.load %arg6[%c0_13, %c0_14] : memref<1x64xf32, #tpu.memory_space<vmem>>, vector<1x64xf32>
    tpu.vector_store %arg6[%c0_13, %c0_14], %18 {strides = array<i32>} : memref<1x64xf32, #tpu.memory_space<vmem>>, vector<1x64xf32>,
    return
  }
  func.func @transform_0(%arg0: i32) -> (i32, i32) {
    %c0_i32 = arith.constant 0 : i32
    %c0_i32_0 = arith.constant 0 : i32
    return %arg0, %c0_i32 : i32, i32
  }
  func.func @transform_1(%arg0: i32) -> (i32, i32) {
    %c0_i32 = arith.constant 0 : i32
    %c0_i32_0 = arith.constant 0 : i32
    %c0_i32_1 = arith.constant 0 : i32
    return %c0_i32, %c0_i32_0 : i32, i32
  }
  func.func @transform_2(%arg0: i32) -> (i32, i32) {
    %c0_i32 = arith.constant 0 : i32
    %c0_i32_0 = arith.constant 0 : i32
    %c0_i32_1 = arith.constant 0 : i32
    return %c0_i32, %c0_i32_0 : i32, i32
  }
  func.func @transform_3(%arg0: i32) -> (i32, i32) {
    %c0_i32 = arith.constant 0 : i32
    %c0_i32_0 = arith.constant 0 : i32
    %c0_i32_1 = arith.constant 0 : i32
    return %c0_i32, %c0_i32_0 : i32, i32
  }
  func.func @transform_4(%arg0: i32) -> (i32, i32) {
    %c0_i32 = arith.constant 0 : i32
    %c0_i32_0 = arith.constant 0 : i32
    %c0_i32_1 = arith.constant 0 : i32
    return %c0_i32, %c0_i32_0 : i32, i32
  }
  func.func @transform_5(%arg0: i32) -> (i32, i32) {
    %c0_i32 = arith.constant 0 : i32
    %c0_i32_0 = arith.constant 0 : i32
    return %c0_i32, %arg0 : i32, i32
  }
}

</mosaic_0001>

<bundles_post_ra>
// kernel: discriminator_forward.1
= control target key start
LH: loop header
LB: loop body
LE: loop exit
PB: predicated region body
PF: predicated region fallthrough
CT: control target
= control target key end

     0   :  { %s348_s0 = inlined_call_operand.vmem [shape: f32[64,32], index: 0, kind: input, shape index: {}]   ;;  %s349_s1 = inlined_call_operand.vmem [shape: f32[32,10], index: 1, kind: input, shape index: {}]   ;;  %s350_s2 = inlined_call_operand.vmem [shape: f32[1,10], index: 2, kind: input, shape index: {}]   ;;  %s351_s3 = inlined_call_operand.vmem [shape: f32[1,10], index: 3, kind: input, shape index: {}]   ;;  %s352_s4 = inlined_call_operand.<no memory space> [shape: f32[1,1], index: 4, kind: input, shape index: {}]   ;;  %s353_s5 = inlined_call_operand.hbm [shape: f32[1,64], index: 5, kind: output, shape index: {}]  }
   0x1   :  { %v10_v0 = vstv %s352_s4 }
   0x2   :  { %11 = vst [vmem:[#allocation2] sm:$0x1] %v10_v0 }
   0x3   :  { %v34_v1 = vld [vmem:[%s349_s1 + $0x18] sm:$0xff]  ;;  %v33_v2 = vld [vmem:[%s349_s1 + $0x10] sm:$0xff]  ;;  %v32_v3 = vld [vmem:[%s349_s1 + $0x8] sm:$0xff] }
   0x4   :  { %209 = vmatpush.msra.mxu2 %v34_v1  ;;  %210 = vmatpush.msra.mxu3 %v34_v1  ;;  %v31_v4 = vld [vmem:[%s349_s1] sm:$0xff] }
   0x5   :  { %76 = vmatpush.msra.mxu0 %v34_v1 }
   0x6   :  { %211 = vmatpush.msra.mxu2 %v33_v2  ;;  %212 = vmatpush.msra.mxu3 %v33_v2 }
   0x7   :  { %77 = vmatpush.msra.mxu0 %v33_v2 }
   0x8   :  { %12 = vsyncpa [#allocation4], 0  ;;  %213 = vmatpush.msra.mxu2 %v32_v3  ;;  %214 = vmatpush.msra.mxu3 %v32_v3  ;;  %v26_v5 = vld [vmem:[%s348_s0 + $0x18] sm:$0xff]  ;;  %vm39_vm0 = vcmask 261120   ;;  %v29_v6 = vld [vmem:[%s348_s0 + $0x30] sm:$0xff]  ;;  %vm121_vm1 = vcmask 80896  }
   0x9   :  { %78 = vmatpush.msra.mxu0 %v32_v3  ;;  %v23_v7 = vld [vmem:[%s348_s0] sm:$0xff]  ;;  %v30_v9 = vld [vmem:[%s348_s0 + $0x38] sm:$0xff]  ;;  %v24_v10 = vld [vmem:[%s348_s0 + $0x8] sm:$0xff]  ;;  %v251_v24 = vmov 0   ;;  %s252_s19 = smov [#allocation3]   ;;  %s183_s23 = sshll.u32 %s353_s5, 4  ;;  %s184_s23 = int_to_ptr.hbm [resolvable:$true] %s183_s23 }
   0xa   :  { %215 = vmatpush.msra.mxu2 %v31_v4  ;;  %216 = vmatpush.msra.mxu3 %v31_v4  ;;  %v27_v8 = vld [vmem:[%s348_s0 + $0x20] sm:$0xff]  ;;  %v28_v11 = vld [vmem:[%s348_s0 + $0x28] sm:$0xff]  ;;  %v25_v12 = vld [vmem:[%s348_s0 + $0x10] sm:$0xff]  ;;  %s181_s20 = sshll.u32 %s252_s19, 4  ;;  %vm174_vm2 = vcmask 516096   ;;  %s182_s20 = int_to_ptr.vmem [resolvable:$true] %s181_s20 }
   0xb   :  { %195 = vmatmul.msk.f32.vlgmr.msra.gmra.mxu2 %vm39_vm0, %v26_v5  ;;  %198 = vmatmul.msk.f32.vlgmr.msra.gmra.mxu3 %vm39_vm0, %v29_v6  ;;  %v220_v16 = vld [vmem:[%s350_s2] ss:$0 sm:$0xff] }
   0xc   :  { %79 = vmatpush.msra.mxu0 %v31_v4  ;;  %v114_v23 = vld [vmem:[#allocation2] sm:$0x1]  ;;  %219 = vset.pattern.permute.xlu0 %v251_v24 }
   0xd   :  { %192 = vmatmul.msk.f32.vlgmr.msra.gmra.mxu0 %vm39_vm0, %v23_v7  ;;  %117 = vperm.xlu0 %219, %v114_v23   ;;  %v113_v40 = vld [vmem:[%s351_s3] sm:$0x1] }
  0x13   :  { %196 = vmatmul.msk.f32.gmra.mxu2 %vm39_vm0, %v27_v8  ;;  %199 = vmatmul.msk.f32.gmra.mxu3 %vm39_vm0, %v30_v9 }
  0x15   :  { %193 = vmatmul.msk.f32.gmra.mxu0 %vm39_vm0, %v24_v10 }
  0x1b   :  { %197 = vmatmul.msk.f32.gmra.mxu2 %vm39_vm0, %v28_v11 }
  0x1d   :  { %194 = vmatmul.msk.f32.gmra.mxu0 %vm39_vm0, %v25_v12 }
  0x7f   :  { %v118_v41 = vpop.permute.xlu0 %117 }
  0x80   :  { %v120_v42 = vperm.slane %v118_v41, 0 }
  0x8a   :  { %v81_v15 = vpop.f32.mrf.mxu0 }
  0x8b   :  { %v82_v37 = vadd.f32 %v220_v16, %v81_v15 }
  0x8d   :  { %v105_v39 = vmax.f32 %v82_v37, 0.0 }
  0x8e   :  { %v90_v13 = vpop.f32.mrf.mxu2  ;;  %v99_v14 = vpop.f32.mrf.mxu3 }
  0x8f   :  { %v100_v20 = vadd.f32 %v220_v16, %v99_v14  ;;  %v91_v31 = vadd.f32 %v220_v16, %v90_v13 }
  0x91   :  { %v111_v25 = vmax.f32 %v100_v20, 0.0  ;;  %v108_v34 = vmax.f32 %v91_v31, 0.0 }
  0x92   :  { %v84_v22 = vpop.f32.mrf.mxu0 }
  0x93   :  { %v85_v36 = vadd.f32 %v220_v16, %v84_v22 }
  0x95   :  { %v106_v38 = vmax.f32 %v85_v36, 0.0 }
  0x96   :  { %v93_v17 = vpop.f32.mrf.mxu2  ;;  %v102_v18 = vpop.f32.mrf.mxu3 }
  0x97   :  { %v103_v19 = vadd.f32 %v220_v16, %v102_v18  ;;  %v94_v28 = vadd.f32 %v220_v16, %v93_v17 }
  0x99   :  { %v112_v21 = vmax.f32 %v103_v19, 0.0  ;;  %v109_v32 = vmax.f32 %v94_v28, 0.0 }
  0x9a   :  { %v87_v30 = vpop.f32.mrf.mxu0 }
  0x9b   :  { %200 = vmatpush.xpose.msk.msra.mxu1 %vm121_vm1, %v112_v21  ;;  %v88_v33 = vadd.f32 %v220_v16, %v87_v30 }
  0x9d   :  { %v107_v35 = vmax.f32 %v88_v33, 0.0 }
  0x9e   :  { %v96_v26 = vpop.f32.mrf.mxu2 }
  0x9f   :  { %v97_v27 = vadd.f32 %v220_v16, %v96_v26  ;;  %201 = vmatpush.xpose.msk.msra.mxu1 %vm121_vm1, %v111_v25 }
  0xa1   :  { %v110_v29 = vmax.f32 %v97_v27, 0.0 }
  0xa3   :  { %202 = vmatpush.xpose.msk.msra.mxu1 %vm121_vm1, %v110_v29 }
  0xa7   :  { %203 = vmatpush.xpose.msk.msra.mxu1 %vm121_vm1, %v109_v32 }
  0xab   :  { %204 = vmatpush.xpose.msk.msra.mxu1 %vm121_vm1, %v108_v34 }
  0xaf   :  { %205 = vmatpush.xpose.msk.msra.mxu1 %vm121_vm1, %v107_v35 }
  0xb3   :  { %206 = vmatpush.xpose.msk.msra.mxu1 %vm121_vm1, %v106_v38 }
  0xb7   :  { %207 = vmatpush.xpose.msk.msra.mxu1 %vm121_vm1, %v105_v39 }
  0xba   :  { %208 = vmatmul.msk.f32.vlgmr.msra.gmra.mxu1 %vm121_vm1, %v113_v40 }
 0x137   :  { %v166_v43 = vpop.f32.mrf.mxu1 }
 0x138   :  { %v167_v44 = vadd.f32 %v166_v43, %v120_v42 }
 0x13a   :  { %v169_v45 = vsub.f32 0.0, %v167_v44 }
 0x13c   :  { %v170_v46 = vmul.f32 1.442695, %v169_v45 }
 0x13e   :  { %221 = vpow2.f32 %v170_v46 }
 0x144   :  { %v222_v47 = vpop.eup %221 }
 0x145   :  { %v172_v48 = vadd.f32 1.0, %v222_v47 }
 0x147   :  { %223 = vrcp.f32 %v172_v48 }
 0x14d   :  { %v224_v49 = vpop.eup %223 }
 0x14e   :  { %175 = vst.msk [vmem:[#allocation3] sm:$0x1] %vm174_vm2, %v224_v49 }
 0x14f   :  { %186 = dma.vmem_to_hbm [thread:$0]  %s182_s20, 16, %s184_s23, [#allocation4]  }
 0x150   :  { %249 = dma.done.wait [#allocation4], 16  }
 0x151   :  { %250 = vsyncadd [#allocation4], 4294967280 }
 0x152   :  { %191 = vsyncpa [#allocation4], 1 }

</bundles_post_ra>
